<compile_context>
chip_gen: v7x
topology: tpu7x:2x2x1
jax: 0.10.0
libtpu: 0.0.40
codegen_flags: <defaults>
</compile_context>

<pallas_src>
import jax
import jax.numpy as jnp
from jax.experimental import pallas as pl
from jax.experimental.pallas import tpu as pltpu


def _round_up(a, m):
    return ((a + m - 1) // m) * m


# --------------------------------------------------------------------------
# Kernel
# --------------------------------------------------------------------------
def _cls_head_kernel(x_ref, wd_ref, bd_ref, wo_ref, bo_ref, out_ref):
    # x_ref:  (TB, H)   features dtype  CLS-token activations for this batch tile
    # wd_ref: (H, H)    bf16            dense weight, (in, out) layout
    # bd_ref: (1, H)    f32
    # wo_ref: (H, LP)   bf16            out_proj weight, (in, out) layout, L padded to LP
    # bo_ref: (1, LP)   f32
    # out_ref:(TB, LP)  f32
    x = x_ref[...].astype(jnp.bfloat16)

    # dense: canonical (M,K)x(K,N) matmul, f32 accumulation on the MXU.
    h = jnp.dot(x, wd_ref[...], preferred_element_type=jnp.float32)
    h = jnp.tanh(h + bd_ref[...])                      # f32 bias add + tanh (EUP)

    # out_proj
    y = jnp.dot(h.astype(jnp.bfloat16), wo_ref[...],
                preferred_element_type=jnp.float32)
    out_ref[...] = (y + bo_ref[...]).astype(out_ref.dtype)


# --------------------------------------------------------------------------
# One-time parameter preparation (call once per checkpoint, cache the result)
# --------------------------------------------------------------------------
def prepare_roberta_head_params(dense_w, dense_b, out_w, out_b):
    """dense_w: (H, H) PyTorch (out,in); dense_b: (H,);
    out_w: (L, H) PyTorch (out,in); out_b: (L,).
    Returns kernel-ready params: bf16 weights pre-transposed to (in,out),
    out_proj padded to a 128-lane label dim, f32 row-vector biases."""
    H = dense_w.shape[1]
    L = out_w.shape[0]
    LP = max(128, _round_up(L, 128))

    wd = jnp.asarray(dense_w, jnp.bfloat16).T                       # (H, H)  (in, out)
    bd = jnp.asarray(dense_b, jnp.float32).reshape(1, H)            # (1, H)
    wo = (jnp.zeros((H, LP), jnp.bfloat16)
          .at[:, :L].set(jnp.asarray(out_w, jnp.bfloat16).T))       # (H, LP) (in, out)
    bo = (jnp.zeros((1, LP), jnp.float32)
          .at[0, :L].set(jnp.asarray(out_b, jnp.float32)))          # (1, LP)
    return (wd, bd, wo, bo, L)


# --------------------------------------------------------------------------
# Forward
# --------------------------------------------------------------------------
def roberta_classification_head(features, params, *, block_b=512, cores=2):
    """features: (B, S, H); params from prepare_roberta_head_params().
    Returns (B, L) f32 logits."""
    wd, bd, wo, bo, num_labels = params
    B, S, H = features.shape
    LP = wo.shape[1]

    # CLS token only: never ship (B, S, H) into VMEM.
    x = features[:, 0, :]                                           # (B, H)

    # Batch tile: >= `cores` grid steps when possible (v7x megacore split),
    # capped at block_b (keeps the 256-wide MXU full, amortizes step overhead).
    B8 = _round_up(B, 8)
    TB = min(block_b, max(8, _round_up(pl.cdiv(B8, max(1, cores)), 8)))
    B_pad = _round_up(B, TB)
    if B_pad != B:
        x = jnp.pad(x, ((0, B_pad - B), (0, 0)))                    # tiny (B, H) pad only

    grid = (B_pad // TB,)
    resident = pl.Buffered(1)   # loop-invariant operands: no second pipeline buffer

    out = pl.pallas_call(
        _cls_head_kernel,
        out_shape=jax.ShapeDtypeStruct((B_pad, LP), jnp.float32),
        grid_spec=pltpu.PrefetchScalarGridSpec(
            num_scalar_prefetch=0,
            grid=grid,
            in_specs=[
                pl.BlockSpec((TB, H), lambda i: (i, 0)),                          # activations: tiled
                pl.BlockSpec((H, H), lambda i: (0, 0), pipeline_mode=resident),   # dense W: resident
                pl.BlockSpec((1, H), lambda i: (0, 0), pipeline_mode=resident),   # dense b: resident
                pl.BlockSpec((H, LP), lambda i: (0, 0), pipeline_mode=resident),  # out_proj W: resident
                pl.BlockSpec((1, LP), lambda i: (0, 0), pipeline_mode=resident),  # out_proj b: resident
            ],
            out_specs=pl.BlockSpec((TB, LP), lambda i: (i, 0)),
        ),
        compiler_params=pltpu.CompilerParams(
            dimension_semantics=("parallel",)),          # megacore-shardable on v7x
    )(x, wd, bd, wo, bo)

    return out[:B, :num_labels]


if __name__ == "__main__":
    # Small config: batch=2, seq=8, hidden=32, num_labels=4
    B, S, H, L = 2, 8, 32, 4
    key = jax.random.PRNGKey(0)
    k_feat, k_wd, k_bd, k_wo, k_bo = jax.random.split(key, 5)

    features = jax.random.normal(k_feat, (B, S, H), dtype=jnp.float32)
    dense_w = jax.random.normal(k_wd, (H, H), dtype=jnp.float32) * 0.02
    dense_b = jax.random.normal(k_bd, (H,), dtype=jnp.float32) * 0.02
    out_w = jax.random.normal(k_wo, (L, H), dtype=jnp.float32) * 0.02
    out_b = jax.random.normal(k_bo, (L,), dtype=jnp.float32) * 0.02

    # Weight prep happens ONCE (cache this in real use), not per forward call.
    params = prepare_roberta_head_params(dense_w, dense_b, out_w, out_b)
    params = jax.block_until_ready(params)

    logits = roberta_classification_head(features, params)
    logits = jax.block_until_ready(logits)

    # Pure-JAX f32 reference (kernel uses bf16 MXU inputs -> loose tolerance).
    x = features[:, 0, :]
    ref = jnp.tanh(x @ dense_w.T + dense_b) @ out_w.T + out_b
    assert logits.shape == (B, L)
    assert logits.dtype == jnp.float32
    assert jnp.allclose(logits, ref, atol=2e-2, rtol=2e-2), \
        f"max abs err {jnp.max(jnp.abs(logits - ref))}"

    print("KERNEL_OK")
</pallas_src>

<mosaic_0001>
module attributes {stable_mosaic.version = 11 : i64} {
  func.func @_cls_head_kernel(%arg0: i32, %arg1: memref<8x32xf32, #tpu.memory_space<vmem>>, %arg2: memref<32x32xbf16, #tpu.memory_space<vmem>>, %arg3: memref<1x32xf32, #tpu.memory_space<vmem>>, %arg4: memref<32x128xbf16, #tpu.memory_space<vmem>>, %arg5: memref<1x128xf32, #tpu.memory_space<vmem>>, %arg6: memref<8x128xf32, #tpu.memory_space<vmem>>) attributes {dimension_semantics = [#tpu.dimension_semantics<parallel>], iteration_bounds = array<i64: 1>, scalar_prefetch = 0 : i64, scratch_operands = 0 : i64, tpu.core_type = #tpu.core_type<tc>, window_params = [{transform_indices = @transform_0, window_bounds = array<i64: 8, 32>}, {pipeline_mode = #tpu.pipeline_mode<synchronous>, transform_indices = @transform_1, window_bounds = array<i64: 32, 32>}, {pipeline_mode = #tpu.pipeline_mode<synchronous>, transform_indices = @transform_2, window_bounds = array<i64: 1, 32>}, {pipeline_mode = #tpu.pipeline_mode<synchronous>, transform_indices = @transform_3, window_bounds = array<i64: 32, 128>}, {pipeline_mode = #tpu.pipeline_mode<synchronous>, transform_indices = @transform_4, window_bounds = array<i64: 1, 128>}, {transform_indices = @transform_5, window_bounds = array<i64: 8, 128>}]} {
    %c0 = arith.constant 0 : index
    %c0_0 = arith.constant 0 : index
    %0 = vector.load %arg1[%c0, %c0_0] : memref<8x32xf32, #tpu.memory_space<vmem>>, vector<8x32xf32>
    %1 = arith.truncf %0 : vector<8x32xf32> to vector<8x32xbf16>
    %c0_1 = arith.constant 0 : index
    %c0_2 = arith.constant 0 : index
    %2 = vector.load %arg2[%c0_1, %c0_2] : memref<32x32xbf16, #tpu.memory_space<vmem>>, vector<32x32xbf16>
    %cst = arith.constant dense<0.000000e+00> : vector<8x32xf32>
    %3 = tpu.matmul %1, %2, %cst {dimension_numbers = #tpu.dot_dimension_numbers<[1], [0], [0], [1], [0, 0, 1, 1], [], []>} : vector<8x32xbf16>, vector<32x32xbf16>, vector<8x32xf32> -> vector<8x32xf32>
    %c0_3 = arith.constant 0 : index
    %c0_4 = arith.constant 0 : index
    %4 = vector.load %arg3[%c0_3, %c0_4] : memref<1x32xf32, #tpu.memory_space<vmem>>, vector<1x32xf32>
    %5 = vector.broadcast %4 : vector<1x32xf32> to vector<8x32xf32>
    %6 = arith.addf %3, %5 : vector<8x32xf32>
    %7 = math.tanh %6 : vector<8x32xf32>
    %8 = arith.truncf %7 : vector<8x32xf32> to vector<8x32xbf16>
    %c0_5 = arith.constant 0 : index
    %c0_6 = arith.constant 0 : index
    %9 = vector.load %arg4[%c0_5, %c0_6] : memref<32x128xbf16, #tpu.memory_space<vmem>>, vector<32x128xbf16>
    %cst_7 = arith.constant dense<0.000000e+00> : vector<8x128xf32>
    %10 = tpu.matmul %8, %9, %cst_7 {dimension_numbers = #tpu.dot_dimension_numbers<[1], [0], [0], [1], [0, 0, 1, 1], [], []>} : vector<8x32xbf16>, vector<32x128xbf16>, vector<8x128xf32> -> vector<8x128xf32>
    %c0_8 = arith.constant 0 : index
    %c0_9 = arith.constant 0 : index
    %11 = vector.load %arg5[%c0_8, %c0_9] : memref<1x128xf32, #tpu.memory_space<vmem>>, vector<1x128xf32>
    %12 = vector.broadcast %11 : vector<1x128xf32> to vector<8x128xf32>
    %13 = arith.addf %10, %12 : vector<8x128xf32>
    %c0_10 = arith.constant 0 : index
    %c0_11 = arith.constant 0 : index
    %14 = vector.load %arg6[%c0_10, %c0_11] : memref<8x128xf32, #tpu.memory_space<vmem>>, vector<8x128xf32>
    tpu.vector_store %arg6[%c0_10, %c0_11], %13 {strides = array<i32>} : memref<8x128xf32, #tpu.memory_space<vmem>>, vector<8x128xf32>,
    return
  }
  func.func @transform_0(%arg0: i32) -> (i32, i32) {
    %c0_i32 = arith.constant 0 : i32
    %c0_i32_0 = arith.constant 0 : i32
    return %arg0, %c0_i32 : i32, i32
  }
  func.func @transform_1(%arg0: i32) -> (i32, i32) {
    %c0_i32 = arith.constant 0 : i32
    %c0_i32_0 = arith.constant 0 : i32
    %c0_i32_1 = arith.constant 0 : i32
    return %c0_i32, %c0_i32_0 : i32, i32
  }
  func.func @transform_2(%arg0: i32) -> (i32, i32) {
    %c0_i32 = arith.constant 0 : i32
    %c0_i32_0 = arith.constant 0 : i32
    %c0_i32_1 = arith.constant 0 : i32
    return %c0_i32, %c0_i32_0 : i32, i32
  }
  func.func @transform_3(%arg0: i32) -> (i32, i32) {
    %c0_i32 = arith.constant 0 : i32
    %c0_i32_0 = arith.constant 0 : i32
    %c0_i32_1 = arith.constant 0 : i32
    return %c0_i32, %c0_i32_0 : i32, i32
  }
  func.func @transform_4(%arg0: i32) -> (i32, i32) {
    %c0_i32 = arith.constant 0 : i32
    %c0_i32_0 = arith.constant 0 : i32
    %c0_i32_1 = arith.constant 0 : i32
    return %c0_i32, %c0_i32_0 : i32, i32
  }
  func.func @transform_5(%arg0: i32) -> (i32, i32) {
    %c0_i32 = arith.constant 0 : i32
    %c0_i32_0 = arith.constant 0 : i32
    return %arg0, %c0_i32 : i32, i32
  }
}

</mosaic_0001>

<bundles_post_ra>
// kernel: tpu_custom_call.1
= control target key start
LH: loop header
LB: loop body
LE: loop exit
PB: predicated region body
PF: predicated region fallthrough
CT: control target
= control target key end

     0   :  { %10 = vsyncpa [#allocation3], 0  ;;  %s453_s0 = inlined_call_operand.hbm [shape: f32[8,32], index: 0, kind: input, shape index: {}]   ;;  %s454_s1 = inlined_call_operand.hbm [shape: bf16[32,32], index: 1, kind: input, shape index: {}]   ;;  %s455_s2 = inlined_call_operand.vmem [shape: f32[1,32], index: 2, kind: input, shape index: {}]   ;;  %s456_s3 = inlined_call_operand.hbm [shape: bf16[32,128], index: 3, kind: input, shape index: {}]   ;;  %s457_s4 = inlined_call_operand.vmem [shape: f32[1,128], index: 4, kind: input, shape index: {}]   ;;  %s458_s5 = inlined_call_operand.hbm [shape: f32[8,128], index: 5, kind: output, shape index: {}]  }
   0x1   :  { %11 = vsyncpa [#allocation6], 0 }
   0x2   :  { %12 = vsyncpa [#allocation4], 0  ;;  %s353_s18 = smov [#allocation5]   ;;  %s259_s22 = scalar_lea.hbm %s454_s1, 256 }
   0x3   :  { %s28_s19 = sshll.u32 %s353_s18, 4  ;;  %p260_p0 = scmp.ne.s32.totalorder %s454_s1, %s259_s22  ;;  %s29_s19 = int_to_ptr.vmem [resolvable:$true] %s28_s19 }
   0x4   :  { %p263_p1 = scmp.lt.u32.totalorder %s259_s22, %s454_s1 }
   0x6   :  { %p265_p2 = pnand %p263_p1, %p260_p0 }
   0x8   :  { %268 = shalt.err (!%p265_p2)
}
   0x9   :  { %s269_s27 = scalar_lea.vmem %s29_s19, 256  ;;  %p274_p4 = scmp.lt.s32.totalorder %s29_s19, %s29_s19 }
   0xa   :  { %p270_p3 = scmp.ne.s32.totalorder %s29_s19, %s269_s27  ;;  %p275_p5 = scmp.lt.s32.totalorder %s269_s27, %s269_s27 }
   0xc   :  { %p276_p6 = por %p275_p5, %p274_p4 }
   0xe   :  { %p277_p7 = pnand %p276_p6, %p270_p3 }
  0x10   :  { %280 = shalt.err (!%p277_p7)
}
  0x11   :  { %s354_s28 = smov 64   ;;  %s355_s29 = smov 4  }
  0x12   :  { %34 = dma.hbm_to_vmem [thread:$0]  %s454_s1, 256, %s29_s19, [#allocation6], %s354_s28, %s354_s28, %s355_s29  }
  0x13   :  { %s356_s7 = smov [#allocation2]   ;;  %s357_s9 = smov [#allocation7]  }
  0x14   :  { %s19_s8 = sshll.u32 %s356_s7, 4  ;;  %s42_s10 = sshll.u32 %s357_s9, 4  ;;  %s20_s8 = int_to_ptr.vmem [resolvable:$true] %s19_s8  ;;  %s43_s10 = int_to_ptr.vmem [resolvable:$true] %s42_s10 }
  0x15   :  { %s281_s13 = scalar_lea.hbm %s453_s0, 128 }
  0x16   :  { %p282_p8 = scmp.ne.s32.totalorder %s453_s0, %s281_s13  ;;  %p285_p9 = scmp.lt.u32.totalorder %s281_s13, %s453_s0 }
  0x18   :  { %p287_p10 = pnand %p285_p9, %p282_p8 }
  0x1a   :  { %290 = shalt.err (!%p287_p10)
}
  0x1b   :  { %s291_s1 = scalar_lea.vmem %s20_s8, 128  ;;  %p296_p12 = scmp.lt.s32.totalorder %s20_s8, %s20_s8 }
  0x1c   :  { %p292_p11 = scmp.ne.s32.totalorder %s20_s8, %s291_s1  ;;  %p297_p13 = scmp.lt.s32.totalorder %s291_s1, %s291_s1 }
  0x1e   :  { %p298_p0 = por %p297_p13, %p296_p12 }
  0x20   :  { %p299_p1 = pnand %p298_p0, %p292_p11 }
  0x22   :  { %302 = shalt.err (!%p299_p1)
}
  0x23   :  { %22 = dma.hbm_to_vmem [thread:$0]  %s453_s0, 128, %s20_s8, [#allocation3]  }
  0x24   :  { %s303_s22 = scalar_lea.hbm %s456_s3, 256 }
  0x25   :  { %p304_p2 = scmp.ne.s32.totalorder %s456_s3, %s303_s22  ;;  %p307_p3 = scmp.lt.u32.totalorder %s303_s22, %s456_s3 }
  0x27   :  { %p309_p4 = pnand %p307_p3, %p304_p2 }
  0x29   :  { %312 = shalt.err (!%p309_p4)
}
  0x2a   :  { %s313_s27 = scalar_lea.vmem %s43_s10, 256  ;;  %p318_p6 = scmp.lt.s32.totalorder %s43_s10, %s43_s10 }
  0x2b   :  { %p314_p5 = scmp.ne.s32.totalorder %s43_s10, %s313_s27  ;;  %p319_p7 = scmp.lt.s32.totalorder %s313_s27, %s313_s27 }
  0x2d   :  { %p320_p8 = por %p319_p7, %p318_p6 }
  0x2f   :  { %p321_p9 = pnand %p320_p8, %p314_p5 }
  0x31   :  { %324 = shalt.err (!%p321_p9)
}
  0x32   :  { %48 = dma.hbm_to_vmem [thread:$0]  %s456_s3, 256, %s43_s10, [#allocation6], %s354_s28, %s354_s28, %s355_s29  }
  0x33   :  { %347 = dma.done.wait [#allocation3], 128  }
  0x34   :  { %348 = vsyncadd [#allocation3], 4294967168 }
  0x35   :  { %349 = dma.done.wait [#allocation6], 512  }
  0x36   :  { %350 = vsyncadd [#allocation6], 4294966784  ;;  %v358_v0 = vmov 0.0   ;;  %vm359_vm0 = vmmov 0   ;;  %v253_v1 = vld [vmem:[#allocation5] sm:$0xff]   ;;  %v254_v2 = vld [vmem:[#allocation5 + $0x8] sm:$0xff]  }
  0x37   :  { %229 = vmatprep.subr.bf16.mxu0 %v358_v0  ;;  %233 = vmatprep.mubr.msk.bf16.mxu0 %vm359_vm0, %v358_v0  ;;  %v61_v3 = vld [vmem:[#allocation2] sm:$0xff]  ;;  %vm86_vm1 = vcmask 261120   ;;  %v255_v5 = vld [vmem:[#allocation7] sm:$0xff]   ;;  %s360_s7 = smov [#allocation8]  }
  0x38   :  { %237 = vmatprep.subr.bf16.mxu1 %v358_v0  ;;  %241 = vmatprep.mubr.msk.bf16.mxu1 %vm359_vm0, %v358_v0  ;;  %v62_v4 = vpack.c.bf16 %v61_v3, %v61_v3  ;;  %v256_v6 = vld [vmem:[#allocation7 + $0x8] sm:$0xff]   ;;  %s205_s8 = sshll.u32 %s360_s7, 4  ;;  %s206_s8 = int_to_ptr.vmem [resolvable:$true] %s205_s8 }
  0x39   :  { %230 = vmatpush3.bf16.msra.mxu0 %v253_v1  ;;  %238 = vmatpush3.bf16.msra.mxu1 %v255_v5  ;;  %v215_v7 = vld [vmem:[%s455_s2] ss:$0 sm:$0xff]  ;;  %s325_s2 = scalar_lea.vmem %s206_s8, 128  ;;  %p330_p11 = scmp.lt.s32.totalorder %s206_s8, %s206_s8 }
  0x3a   :  { %231 = vmatprep.subr.bf16.mxu0 %v358_v0  ;;  %239 = vmatprep.subr.bf16.mxu1 %v358_v0  ;;  %v219_v15 = vld [vmem:[%s457_s4] ss:$0 sm:$0xff]  ;;  %p326_p10 = scmp.ne.s32.totalorder %s206_s8, %s325_s2  ;;  %p331_p12 = scmp.lt.s32.totalorder %s325_s2, %s325_s2 }
  0x3c   :  { %p332_p13 = por %p331_p12, %p330_p11 }
  0x3d   :  { %232 = vmatpush3.bf16.msra.mxu0 %v254_v2  ;;  %240 = vmatpush3.bf16.msra.mxu1 %v256_v6 }
  0x3e   :  { %p333_p0 = pnand %p332_p13, %p326_p10 }
  0x40   :  { %234 = vmatmul.mubr.msk.bf16.vlgmr.msra.gmra.mrb[0].mxu0 %vm86_vm1, %v62_v4 }
 0x113   :  { %v124_v8 = vpop.f32.mrb[0].mxu0 }
 0x114   :  { %v125_v9 = vadd.f32 %v215_v7, %v124_v8  ;;  %v235_v10 = vpop.f32.mrb[1].mxu0 }
 0x115   :  { %v127_v11 = vpop.f32.mrb[2].mxu0 }
 0x116   :  { %257 = vtanh.f32 %v125_v9  ;;  %v236_v12 = vpop.f32.mrb[3].mxu0 }
 0x120   :  { %v258_v13 = vpop.eup %257 }
 0x121   :  { %v131_v14 = vpack.c.bf16 %v258_v13, %v258_v13 }
 0x123   :  { %242 = vmatmul.mubr.msk.bf16.vlgmr.msra.gmra.mrb[0].mxu1 %vm86_vm1, %v131_v14 }
 0x1f6   :  { %v192_v16 = vpop.f32.mrb[0].mxu1 }
 0x1f7   :  { %v193_v17 = vadd.f32 %v219_v15, %v192_v16  ;;  %v243_v18 = vpop.f32.mrb[1].mxu1 }
 0x1f8   :  { %v195_v19 = vpop.f32.mrb[2].mxu1 }
 0x1f9   :  { %198 = vst [vmem:[#allocation8] sm:$0xff] %v193_v17  ;;  %v244_v20 = vpop.f32.mrb[3].mxu1 }
 0x1fa   :  { %336 = shalt.err (!%p333_p0)
}
 0x1fb   :  { %s337_s4 = scalar_lea.hbm %s458_s5, 128 }
 0x1fc   :  { %p338_p1 = scmp.ne.s32.totalorder %s458_s5, %s337_s4  ;;  %p341_p2 = scmp.lt.u32.totalorder %s337_s4, %s458_s5 }
 0x1fe   :  { %p343_p3 = pnand %p341_p2, %p338_p1 }
 0x200   :  { %346 = shalt.err (!%p343_p3)
}
 0x201   :  { %208 = dma.vmem_to_hbm [thread:$0]  %s206_s8, 128, %s458_s5, [#allocation4]  }
 0x202   :  { %351 = dma.done.wait [#allocation4], 128  }
 0x203   :  { %352 = vsyncadd [#allocation4], 4294967168 }
 0x204   :  { %212 = vsyncpa [#allocation3], 1 }
 0x205   :  { %213 = vsyncpa [#allocation6], 1 }
 0x206   :  { %214 = vsyncpa [#allocation4], 1 }

</bundles_post_ra>
